<compile_context>
chip_gen: v7x
topology: tpu7x:2x2x1
jax: 0.10.0
libtpu: 0.0.40
codegen_flags: <defaults>
</compile_context>

<pallas_src>
import functools

import jax
import jax.numpy as jnp
from jax import lax
from jax.experimental import pallas as pl
from jax.experimental.pallas import tpu as pltpu


def _round_up(x, m):
    return (x + m - 1) // m * m


def _forward_taxo_kernel(tile_level_ref, node_ref, cat_ref, aux_ref, trans_ref,
                         out_ref, *, lambda_taxo, true_b):
    """One batch tile (single taxonomy level per tile).

    tile_level_ref: (n_tiles,) SMEM  per-tile level id (scalar prefetch; only
                                     used by the transforms index_map)
    node_ref : (BT, E)   raw node-embedding rows (level-grouped, zero-padded)
    cat_ref  : (BT, E)   raw category-embedding rows
    aux_ref  : (BT, 8)   col0=bias, col1=label, col2=valid
    trans_ref: (1, E, E) L2-normalized transform for THIS tile's level
    out_ref  : (1, 1)    resident scalar accumulator / final loss
    """
    del tile_level_ref
    pid = pl.program_id(0)

    @pl.when(pid == 0)
    def _init():
        out_ref[...] = jnp.zeros_like(out_ref)

    node = node_ref[...]
    cat = cat_ref[...]

    # nn.Embedding(max_norm=1): rescale rows whose L2 norm exceeds 1 to unit
    # norm.  rsqrt keeps this on the EUP and stays finite on zero padded rows.
    def renorm(x):
        ss = jnp.sum(x * x, axis=-1, keepdims=True)
        return x * jnp.minimum(1.0, lax.rsqrt(ss + 1e-30))

    node = renorm(node)
    cat = renorm(cat)

    aux = aux_ref[...]
    bias = aux[:, 0:1]                      # (BT, 1)
    label = aux[:, 1:2]                     # (BT, 1)
    valid = aux[:, 2:3]                     # (BT, 1) 0 for padded rows

    # Single (BT, E) x (E, E) MXU matmul for this tile's level.
    proj = jnp.dot(node, trans_ref[0], preferred_element_type=jnp.float32)
    score = jnp.sum(proj * cat, axis=-1, keepdims=True) + bias

    # Numerically stable binary_cross_entropy_with_logits; padded rows masked.
    per = (jnp.maximum(score, 0.0) - score * label
           + jnp.log1p(jnp.exp(-jnp.abs(score))))
    out_ref[...] += jnp.sum(per * valid).reshape(1, 1)

    @pl.when(pid == pl.num_programs(0) - 1)
    def _finalize():
        out_ref[...] = out_ref[...] * (lambda_taxo / true_b)


def forward_taxo(params, nodes, labels, levels, lambda_taxo, *, block_b=512):
    """Pallas implementation of AbstractGANClass.forward_taxo (transform=True)."""
    node_emd = params["node_emd"]            # (n_node, E)
    taxo_emd = params["taxo_emd"]            # (n_category, E)
    taxo_bias = params["taxo_bias_vector"]   # (n_category,)
    transforms = params["transforms"]        # (L, E, E)
    L, E, _ = transforms.shape
    B = nodes.shape[0]

    # F.normalize(self.transforms, p=2, dim=1) done once in plain XLA —
    # O(L*E^2), keeps the normalized table off the kernel's warm-up path and
    # out of its VMEM scratch budget.
    tnorm = (transforms / jnp.maximum(
        jnp.linalg.norm(transforms, axis=1, keepdims=True), 1e-12)
             ).astype(jnp.float32)

    # Batch tile: multiple of 8 sublanes, no larger than the (padded) batch.
    bt = _round_up(min(int(block_b), _round_up(B, 8)), 8)

    # --- Level grouping ------------------------------------------------------
    # Rows are sorted by level and each level group is padded to a multiple of
    # the tile, so every tile has exactly one level and the kernel does a
    # single matmul per tile (no max_level x one-hot redundancy).
    levels = jnp.clip(levels.astype(jnp.int32), 0, L - 1)
    n_tiles = pl.cdiv(B + L * (bt - 1), bt)          # static worst case
    total_cap = n_tiles * bt

    counts = jnp.sum(levels[:, None] == jnp.arange(L, dtype=jnp.int32)[None, :],
                     axis=0).astype(jnp.int32)                    # (L,)
    padded_counts = ((counts + bt - 1) // bt) * bt                # (L,)
    zero = jnp.zeros((1,), jnp.int32)
    group_start_pad = jnp.concatenate(
        [zero, jnp.cumsum(padded_counts)[:-1].astype(jnp.int32)])
    group_start_srt = jnp.concatenate(
        [zero, jnp.cumsum(counts)[:-1].astype(jnp.int32)])

    order = jnp.argsort(levels)                                   # stable
    sorted_levels = levels[order]
    rank = jnp.arange(B, dtype=jnp.int32) - group_start_srt[sorted_levels]
    dest = group_start_pad[sorted_levels] + rank                  # (B,)

    # Per-tile level id for the transforms index_map (scalar-prefetched).
    group_end_pad = jnp.cumsum(padded_counts).astype(jnp.int32)   # (L,)
    tile_start = jnp.arange(n_tiles, dtype=jnp.int32) * bt
    tile_level = jnp.sum(
        (tile_start[:, None] >= group_end_pad[None, :]).astype(jnp.int32),
        axis=1)
    tile_level = jnp.minimum(tile_level, L - 1).astype(jnp.int32)

    # Glue: embedding lookups (data-dependent row gathers) + scatter into the
    # level-grouped padded layout.
    # TODO(synk): fuse these gathers into the kernel (scalar-prefetched row ids
    # + manual DMA gather from HBM) to drop the extra (B, E) HBM round-trip.
    node_rows = jnp.take(node_emd, nodes[order, 0], axis=0).astype(jnp.float32)
    cat_rows = jnp.take(taxo_emd, nodes[order, 1], axis=0).astype(jnp.float32)
    bias_rows = jnp.take(taxo_bias, nodes[order, 1], axis=0).astype(jnp.float32)
    labels_s = labels[order].astype(jnp.float32)

    node_pad = jnp.zeros((total_cap, E), jnp.float32).at[dest].set(node_rows)
    cat_pad = jnp.zeros((total_cap, E), jnp.float32).at[dest].set(cat_rows)

    aux_w = 8
    aux_rows = jnp.concatenate(
        [bias_rows[:, None], labels_s[:, None],
         jnp.ones((B, 1), jnp.float32),
         jnp.zeros((B, aux_w - 3), jnp.float32)], axis=1)
    aux_pad = jnp.zeros((total_cap, aux_w), jnp.float32).at[dest].set(aux_rows)

    kernel = functools.partial(
        _forward_taxo_kernel,
        lambda_taxo=float(lambda_taxo),
        true_b=float(B),
    )

    cost = pl.CostEstimate(
        flops=int(2 * total_cap * E * E + 12 * total_cap * E),
        transcendentals=int(4 * total_cap),
        bytes_accessed=int(4 * (2 * total_cap * E + total_cap * aux_w
                                + L * E * E + n_tiles + 1)),
    )

    # TODO(synk): on v7x, split the reduction over the 2 TensorCores with an
    # extra leading "parallel" grid axis and a (2, 1) partial-sum output.
    loss = pl.pallas_call(
        kernel,
        out_shape=jax.ShapeDtypeStruct((1, 1), jnp.float32),
        grid_spec=pltpu.PrefetchScalarGridSpec(
            num_scalar_prefetch=1,
            grid=(n_tiles,),
            in_specs=[
                pl.BlockSpec((bt, E), lambda i, lvl: (i, 0)),      # node rows
                pl.BlockSpec((bt, E), lambda i, lvl: (i, 0)),      # cat rows
                pl.BlockSpec((bt, aux_w), lambda i, lvl: (i, 0)),  # packed aux
                # Transform block for this tile's level (re-DMA'd only when
                # the level changes, i.e. at group boundaries).
                pl.BlockSpec((1, E, E), lambda i, lvl: (lvl[i], 0, 0)),
            ],
            out_specs=pl.BlockSpec((1, 1), lambda i, lvl: (0, 0)),
        ),
        compiler_params=pltpu.CompilerParams(
            # batch axis is a reduction into the resident (1,1) output block.
            dimension_semantics=("arbitrary",),
            vmem_limit_bytes=32 * 1024 * 1024,
        ),
        cost_estimate=cost,
    )(tile_level, node_pad, cat_pad, aux_pad, tnorm)
    return loss[0, 0]


def _reference_forward_taxo(params, nodes, labels, levels, lambda_taxo):
    """Pure-JAX reference mirroring the PyTorch code (f32)."""
    def renorm(x):
        n = jnp.linalg.norm(x, axis=-1, keepdims=True)
        return x * jnp.where(n > 1.0, 1.0 / n, 1.0)

    trans = params["transforms"]
    trans = trans / jnp.maximum(
        jnp.linalg.norm(trans, axis=1, keepdims=True), 1e-12)
    node = renorm(jnp.take(params["node_emd"], nodes[:, 0], axis=0))
    cat = renorm(jnp.take(params["taxo_emd"], nodes[:, 1], axis=0))
    bias = jnp.take(params["taxo_bias_vector"], nodes[:, 1], axis=0)
    proj = jnp.einsum("be,bef->bf", node, trans[levels])
    score = jnp.sum(proj * cat, axis=-1) + bias
    y = labels.astype(jnp.float32)
    per = jnp.maximum(score, 0.0) - score * y + jnp.log1p(jnp.exp(-jnp.abs(score)))
    return jnp.mean(per) * lambda_taxo


if __name__ == "__main__":
    # Small, forward-consistent shapes.  batch=20 with block_b=8 exercises a
    # multi-tile grid with mixed levels, per-group padding, and masked rows.
    n_node, n_category, emd_size, max_level = 64, 16, 32, 4
    batch = 20
    lamb, lambda_taxo = 1e-5, 0.5

    key = jax.random.PRNGKey(0)
    k_node, k_taxo, k_trans, k_nid, k_cid, k_lab, k_lvl = jax.random.split(key, 7)

    stdv = 1.0 / (emd_size ** 0.5)
    params = {
        # nn.Embedding default init ~ N(0, 1); max_norm=1 applied at lookup time.
        "node_emd": jax.random.normal(k_node, (n_node, emd_size), jnp.float32),
        "taxo_emd": jax.random.normal(k_taxo, (n_category, emd_size), jnp.float32),
        "taxo_bias_vector": jnp.zeros((n_category,), jnp.float32),
        # self.transforms ~ U(-stdv, stdv)
        "transforms": jax.random.uniform(
            k_trans, (max_level, emd_size, emd_size), jnp.float32,
            minval=-stdv, maxval=stdv),
    }
    # TODO(synk): the transform=False branch (no per-level projection) is a
    # trivial variant and is not separately wired here.

    node_ids = jax.random.randint(k_nid, (batch,), 0, n_node)
    cat_ids = jax.random.randint(k_cid, (batch,), 0, n_category)
    nodes = jnp.stack([node_ids, cat_ids], axis=1)                  # (B, 2)
    labels = jax.random.bernoulli(k_lab, 0.5, (batch,)).astype(jnp.float32)
    levels = jax.random.randint(k_lvl, (batch,), 0, max_level)

    ref = _reference_forward_taxo(params, nodes, labels, levels, lambda_taxo)

    # Small-tile path (multi-tile grid, padded groups).
    loss_small = forward_taxo(params, nodes, labels, levels, lambda_taxo,
                              block_b=8)
    loss_small = jax.block_until_ready(loss_small)
    assert jnp.allclose(loss_small, ref, rtol=1e-5, atol=1e-5), (loss_small, ref)

    # Default-tile path (single big tile per level group).
    loss_big = forward_taxo(params, nodes, labels, levels, lambda_taxo)
    loss_big = jax.block_until_ready(loss_big)
    assert jnp.allclose(loss_big, ref, rtol=1e-5, atol=1e-5), (loss_big, ref)

    print("KERNEL_OK")
</pallas_src>

<mosaic_0001>
module attributes {stable_mosaic.version = 11 : i64} {
  func.func @_forward_taxo_kernel(%arg0: i32, %arg1: memref<6xi32, #tpu.memory_space<smem>>, %arg2: memref<8x32xf32, #tpu.memory_space<vmem>>, %arg3: memref<8x32xf32, #tpu.memory_space<vmem>>, %arg4: memref<8x8xf32, #tpu.memory_space<vmem>>, %arg5: memref<1x32x32xf32, #tpu.memory_space<vmem>>, %arg6: memref<1x1xf32, #tpu.memory_space<vmem>>) attributes {dimension_semantics = [#tpu.dimension_semantics<arbitrary>], iteration_bounds = array<i64: 6>, scalar_prefetch = 1 : i64, scratch_operands = 0 : i64, tpu.core_type = #tpu.core_type<tc>, window_params = [{transform_indices = @transform_0, window_bounds = array<i64: 8, 32>}, {transform_indices = @transform_1, window_bounds = array<i64: 8, 32>}, {transform_indices = @transform_2, window_bounds = array<i64: 8, 8>}, {transform_indices = @transform_3, window_bounds = array<i64: 1, 32, 32>}, {pipeline_mode = #tpu.pipeline_mode<synchronous>, transform_indices = @transform_4, window_bounds = array<i64: 1, 1>}]} {
    %c0_i32 = arith.constant 0 : i32
    %0 = arith.cmpi eq, %arg0, %c0_i32 : i32
    %1 = arith.extui %0 : i1 to i32
    %c0_i32_0 = arith.constant 0 : i32
    %2 = arith.cmpi ne, %1, %c0_i32_0 : i32
    scf.if %2 {
      %cst_24 = arith.constant 0.000000e+00 : f32
      %58 = vector.broadcast %cst_24 : f32 to vector<1x1xf32>
      %c0_25 = arith.constant 0 : index
      %c0_26 = arith.constant 0 : index
      %59 = vector.load %arg6[%c0_25, %c0_26] : memref<1x1xf32, #tpu.memory_space<vmem>>, vector<1x1xf32>
      tpu.vector_store %arg6[%c0_25, %c0_26], %58 {strides = array<i32>} : memref<1x1xf32, #tpu.memory_space<vmem>>, vector<1x1xf32>,
    } else {
    }
    %c0 = arith.constant 0 : index
    %c0_1 = arith.constant 0 : index
    %3 = vector.load %arg2[%c0, %c0_1] : memref<8x32xf32, #tpu.memory_space<vmem>>, vector<8x32xf32>
    %c0_2 = arith.constant 0 : index
    %c0_3 = arith.constant 0 : index
    %4 = vector.load %arg3[%c0_2, %c0_3] : memref<8x32xf32, #tpu.memory_space<vmem>>, vector<8x32xf32>
    %5 = arith.mulf %3, %3 : vector<8x32xf32>
    %cst = arith.constant dense<0.000000e+00> : vector<8xf32>
    %6 = vector.multi_reduction <add>, %5, %cst [1] : vector<8x32xf32> to vector<8xf32>
    %7 = vector.shape_cast %6 : vector<8xf32> to vector<8x1xf32>
    %cst_4 = arith.constant 1.000000e-30 : f32
    %8 = vector.broadcast %cst_4 : f32 to vector<8x1xf32>
    %9 = arith.addf %7, %8 : vector<8x1xf32>
    %10 = math.rsqrt %9 : vector<8x1xf32>
    %cst_5 = arith.constant 1.000000e+00 : f32
    %11 = vector.broadcast %cst_5 : f32 to vector<8x1xf32>
    %12 = arith.minimumf %11, %10 : vector<8x1xf32>
    %13 = vector.broadcast %12 : vector<8x1xf32> to vector<8x32xf32>
    %14 = arith.mulf %3, %13 : vector<8x32xf32>
    %15 = arith.mulf %4, %4 : vector<8x32xf32>
    %cst_6 = arith.constant dense<0.000000e+00> : vector<8xf32>
    %16 = vector.multi_reduction <add>, %15, %cst_6 [1] : vector<8x32xf32> to vector<8xf32>
    %17 = vector.shape_cast %16 : vector<8xf32> to vector<8x1xf32>
    %cst_7 = arith.constant 1.000000e-30 : f32
    %18 = vector.broadcast %cst_7 : f32 to vector<8x1xf32>
    %19 = arith.addf %17, %18 : vector<8x1xf32>
    %20 = math.rsqrt %19 : vector<8x1xf32>
    %cst_8 = arith.constant 1.000000e+00 : f32
    %21 = vector.broadcast %cst_8 : f32 to vector<8x1xf32>
    %22 = arith.minimumf %21, %20 : vector<8x1xf32>
    %23 = vector.broadcast %22 : vector<8x1xf32> to vector<8x32xf32>
    %24 = arith.mulf %4, %23 : vector<8x32xf32>
    %c0_9 = arith.constant 0 : index
    %c0_10 = arith.constant 0 : index
    %25 = vector.load %arg4[%c0_9, %c0_10] : memref<8x8xf32, #tpu.memory_space<vmem>>, vector<8x8xf32>
    %26 = vector.extract_strided_slice %25 {offsets = [0, 0], sizes = [8, 1], strides = [1, 1]} : vector<8x8xf32> to vector<8x1xf32>
    %27 = vector.extract_strided_slice %25 {offsets = [0, 1], sizes = [8, 1], strides = [1, 1]} : vector<8x8xf32> to vector<8x1xf32>
    %28 = vector.extract_strided_slice %25 {offsets = [0, 2], sizes = [8, 1], strides = [1, 1]} : vector<8x8xf32> to vector<8x1xf32>
    %c0_11 = arith.constant 0 : index
    %c0_12 = arith.constant 0 : index
    %c0_13 = arith.constant 0 : index
    %29 = vector.load %arg5[%c0_11, %c0_12, %c0_13] : memref<1x32x32xf32, #tpu.memory_space<vmem>>, vector<1x32x32xf32>
    %30 = vector.shape_cast %29 : vector<1x32x32xf32> to vector<32x32xf32>
    %cst_14 = arith.constant dense<0.000000e+00> : vector<8x32xf32>
    %31 = tpu.matmul %14, %30, %cst_14 {dimension_numbers = #tpu.dot_dimension_numbers<[1], [0], [0], [1], [0, 0, 1, 1], [], []>} : vector<8x32xf32>, vector<32x32xf32>, vector<8x32xf32> -> vector<8x32xf32>
    %32 = arith.mulf %31, %24 : vector<8x32xf32>
    %cst_15 = arith.constant dense<0.000000e+00> : vector<8xf32>
    %33 = vector.multi_reduction <add>, %32, %cst_15 [1] : vector<8x32xf32> to vector<8xf32>
    %34 = vector.shape_cast %33 : vector<8xf32> to vector<8x1xf32>
    %35 = arith.addf %34, %26 : vector<8x1xf32>
    %cst_16 = arith.constant 0.000000e+00 : f32
    %36 = vector.broadcast %cst_16 : f32 to vector<8x1xf32>
    %37 = arith.maximumf %35, %36 : vector<8x1xf32>
    %38 = arith.mulf %35, %27 : vector<8x1xf32>
    %39 = arith.subf %37, %38 : vector<8x1xf32>
    %40 = math.absf %35 : vector<8x1xf32>
    %cst_17 = arith.constant 0.000000e+00 : f32
    %41 = vector.broadcast %cst_17 : f32 to vector<8x1xf32>
    %42 = arith.subf %41, %40 : vector<8x1xf32>
    %43 = math.exp %42 : vector<8x1xf32>
    %44 = math.log1p %43 : vector<8x1xf32>
    %45 = arith.addf %39, %44 : vector<8x1xf32>
    %c0_18 = arith.constant 0 : index
    %c0_19 = arith.constant 0 : index
    %46 = vector.load %arg6[%c0_18, %c0_19] : memref<1x1xf32, #tpu.memory_space<vmem>>, vector<1x1xf32>
    %47 = arith.mulf %45, %28 : vector<8x1xf32>
    %48 = vector.shape_cast %47 : vector<8x1xf32> to vector<1x8x1xf32>
    %cst_20 = arith.constant dense<0.000000e+00> : vector<1xf32>
    %49 = vector.multi_reduction <add>, %48, %cst_20 [1, 2] : vector<1x8x1xf32> to vector<1xf32>
    %50 = vector.shape_cast %49 : vector<1xf32> to vector<1x1x1xf32>
    %51 = vector.extract %50[0, 0, 0] : f32 from vector<1x1x1xf32>
    %52 = vector.broadcast %51 : f32 to vector<1x1xf32>
    %53 = arith.addf %46, %52 : vector<1x1xf32>
    %c0_21 = arith.constant 0 : index
    %c0_22 = arith.constant 0 : index
    %54 = vector.load %arg6[%c0_21, %c0_22] : memref<1x1xf32, #tpu.memory_space<vmem>>, vector<1x1xf32>
    tpu.vector_store %arg6[%c0_21, %c0_22], %53 {strides = array<i32>} : memref<1x1xf32, #tpu.memory_space<vmem>>, vector<1x1xf32>,
    %c5_i32 = arith.constant 5 : i32
    %55 = arith.cmpi eq, %arg0, %c5_i32 : i32
    %56 = arith.extui %55 : i1 to i32
    %c0_i32_23 = arith.constant 0 : i32
    %57 = arith.cmpi ne, %56, %c0_i32_23 : i32
    scf.if %57 {
      %c0_24 = arith.constant 0 : index
      %c0_25 = arith.constant 0 : index
      %58 = vector.load %arg6[%c0_24, %c0_25] : memref<1x1xf32, #tpu.memory_space<vmem>>, vector<1x1xf32>
      %cst_26 = arith.constant 2.500000e-02 : f32
      %59 = vector.broadcast %cst_26 : f32 to vector<1x1xf32>
      %60 = arith.mulf %58, %59 : vector<1x1xf32>
      %c0_27 = arith.constant 0 : index
      %c0_28 = arith.constant 0 : index
      %61 = vector.load %arg6[%c0_27, %c0_28] : memref<1x1xf32, #tpu.memory_space<vmem>>, vector<1x1xf32>
      tpu.vector_store %arg6[%c0_27, %c0_28], %60 {strides = array<i32>} : memref<1x1xf32, #tpu.memory_space<vmem>>, vector<1x1xf32>,
    } else {
    }
    return
  }
  func.func @transform_0(%arg0: i32, %arg1: memref<6xi32, #tpu.memory_space<smem>>) -> (i32, i32) {
    %c0_i32 = arith.constant 0 : i32
    %c0_i32_0 = arith.constant 0 : i32
    return %arg0, %c0_i32 : i32, i32
  }
  func.func @transform_1(%arg0: i32, %arg1: memref<6xi32, #tpu.memory_space<smem>>) -> (i32, i32) {
    %c0_i32 = arith.constant 0 : i32
    %c0_i32_0 = arith.constant 0 : i32
    return %arg0, %c0_i32 : i32, i32
  }
  func.func @transform_2(%arg0: i32, %arg1: memref<6xi32, #tpu.memory_space<smem>>) -> (i32, i32) {
    %c0_i32 = arith.constant 0 : i32
    %c0_i32_0 = arith.constant 0 : i32
    return %arg0, %c0_i32 : i32, i32
  }
  func.func @transform_3(%arg0: i32, %arg1: memref<6xi32, #tpu.memory_space<smem>>) -> (i32, i32, i32) {
    %0 = arith.index_cast %arg0 : i32 to index
    %1 = memref.load %arg1[%0] : memref<6xi32, #tpu.memory_space<smem>>
    %c0_i32 = arith.constant 0 : i32
    %c0_i32_0 = arith.constant 0 : i32
    %c0_i32_1 = arith.constant 0 : i32
    return %1, %c0_i32, %c0_i32_0 : i32, i32, i32
  }
  func.func @transform_4(%arg0: i32, %arg1: memref<6xi32, #tpu.memory_space<smem>>) -> (i32, i32) {
    %c0_i32 = arith.constant 0 : i32
    %c0_i32_0 = arith.constant 0 : i32
    %c0_i32_1 = arith.constant 0 : i32
    return %c0_i32, %c0_i32_0 : i32, i32
  }
}

</mosaic_0001>

<bundles_post_ra>
// kernel: tpu_custom_call.1
= control target key start
LH: loop header
LB: loop body
LE: loop exit
PB: predicated region body
PF: predicated region fallthrough
CT: control target
= control target key end

     0   :  { %s723_s0 = inlined_call_operand.vmem [shape: s32[6], index: 0, kind: input, shape index: {}]   ;;  %s724_s1 = inlined_call_operand.vmem [shape: f32[48,32], index: 1, kind: input, shape index: {}]   ;;  %s725_s2 = inlined_call_operand.vmem [shape: f32[48,32], index: 2, kind: input, shape index: {}]   ;;  %s726_s3 = inlined_call_operand.vmem [shape: f32[48,8], index: 3, kind: input, shape index: {}]   ;;  %s727_s4 = inlined_call_operand.vmem [shape: f32[4,32,32], index: 4, kind: input, shape index: {}]   ;;  %s728_s5 = inlined_call_operand.hbm [shape: f32[1,1], index: 5, kind: output, shape index: {}]  }
   0x1   :  { %s10_s20 = sshll.u32 %s723_s0, 4  ;;  %s11_s20 = int_to_ptr.vmem [resolvable:$true] %s10_s20 }
   0x2   :  { %s558_s21 = scalar_lea.vmem %s11_s20, 16  ;;  %p563_p1 = scmp.lt.s32.totalorder %s11_s20, %s11_s20 }
   0x3   :  { %p559_p0 = scmp.ne.s32.totalorder %s11_s20, %s558_s21  ;;  %p564_p2 = scmp.lt.s32.totalorder %s558_s21, %s558_s21 }
   0x5   :  { %p565_p3 = por %p564_p2, %p563_p1 }
   0x7   :  { %p566_p4 = pnand %p565_p3, %p559_p0 }
   0x9   :  { %569 = shalt.err (!%p566_p4)  }
   0xa   :  { %s610_s22 = smov [#allocation3]  }
   0xb   :  { %13 = dma.vmem_to_smem %s11_s20, 16, %s610_s22, [#allocation2] }
   0xc   :  { %600 = dma.done.wait [#allocation2], 16 }
   0xd   :  { %601 = vsyncadd [#allocation2], 4294967280 }
   0xe   :  { %15 = sfence }
   0xf   :  { %16 = vsyncpa [#allocation5], 0  ;;  %s651_s23 = smov 0  }
  0x10 LB: > { %s657_s0 = sadd.s32 4294967295, %s608_s23   ;;  %p490_p5 = scmp.ge.s32.totalorder %s608_s23, 1  ;;  %s608_s23 = sphi %s651_s23, %s22_s23  }
  0x11   : > { %p196_p6 = scmp.lt.s32.totalorder %s608_s23, 7 }
  0x13   : > { %p197_p7 = pnand %p490_p5, %p196_p6 }
  0x14   : > { %p230_p8 = scmp.lt.s32.totalorder (!%p197_p7), %s657_s0, 5  ;;  %s242_s24 = sld [smem:[#allocation3 + %s657_s0]] (!%p197_p7) }
  0x15   : > { %200 = sbr.rel (%p197_p7) target bundleno = 839 (0x347), region = 36  ;;  %p496_p10 = scmp.ne.s32.totalorder (!%p197_p7), %s657_s0, 0 }
  0x1a   : > { %p243_p9 = scmp.lt.s32.totalorder (!%p197_p7), %s242_s24, 3 }
  0x1c   : > { %s231_s25 = scalar_select %p230_p8, %s657_s0, 5 }
  0x1d   : > { %s730_s24 = smov (!%p243_p9, %s242_s24), 3  ;;  %252 = sbr.rel (%p496_p10) target bundleno = 36 (0x24), region = 40 }
  0x1e   : > { %s664_s26 = sshll.u32 %s231_s25, 3  ;;  %s503_s11 = sshll.u32 %s730_s24, 5  ;;  %vm253_vm0 = vcmask (!%p496_p10), 0   ;;  %v611_v0 = vmov (!%p496_p10), 0.0  }
  0x1f   : > { %s233_s29 = scalar_lea.vmem %s724_s1, %s664_s26  ;;  %s237_s7 = scalar_lea.vmem %s725_s2, %s664_s26  ;;  %254 = vst.msk [vmem:[#allocation4] sm:$0x1] (!%p496_p10), %vm253_vm0, %v611_v0 }
  0x20   : > { %s241_s10 = scalar_lea.vmem %s726_s3, %s664_s26  ;;  %s247_s14 = scalar_lea.vmem %s727_s4, %s503_s11 }
  0x24 PF: > { %v255_v1 = vld [vmem:[%s233_s29] sm:$0xff]  ;;  %vm258_vm1 = vcmask 261120   ;;  %v276_v5 = vld [vmem:[%s247_s14 + $0x8] sm:$0xff]  ;;  %v612_v7 = vmov 0.0|0.0   ;;  %v277_v8 = vld [vmem:[%s247_s14 + $0x10] sm:$0xff]  ;;  %vm613_vm2 = vmmov 0  }
  0x25   : > { %v257_v2 = vmul.f32 %v255_v1, %v255_v1  ;;  %v275_v4 = vld [vmem:[%s247_s14] sm:$0xff]  ;;  %520 = vmatprep.subr.bf16.mxu0 %v612_v7  ;;  %v278_v9 = vld [vmem:[%s247_s14 + $0x18] sm:$0xff]  ;;  %v614_v11 = vmov 0.0   ;;  %s615_s19 = smov 126   ;;  %s616_s20 = smov 127   ;;  %vm383_vm4 = vcmask 7168  }
  0x26   : > { %v521_v6 = vpack.c.bf16 %v276_v5, %v275_v4  ;;  %v524_v10 = vpack.c.bf16 %v278_v9, %v277_v8  ;;  %517 = vmatprep.mubr.msk.f32.mxu0 %vm613_vm2, %v614_v11  ;;  %v256_v12 = vld [vmem:[%s237_s7] sm:$0xff]  ;;  %vm396_vm5 = vcmask 0   ;;  %p498_p11 = scmp.ne.s32.totalorder %s657_s0, 5 }
  0x27   : > { %v259_v3 = vsel %vm258_vm1, %v257_v2, 0.0  ;;  %v266_v13 = vmul.f32 %v256_v12, %v256_v12  ;;  %v274_v20 = vld [vmem:[%s241_s10] sm:$0xff] }
  0x28   : > { %260 = vadd.xlane.f32.xlu0 %v259_v3  ;;  %522 = vmatpush3.bf16.msra.mxu0 %v521_v6  ;;  %v378_v59 = vld [vmem:[#allocation4] sm:$0x1] }
  0x29   : > { %523 = vmatprep.subr.bf16.mxu0 %v612_v7  ;;  %v267_v14 = vsel %vm258_vm1, %v266_v13, 0.0 }
  0x2c   : > { %525 = vmatpush3.bf16.msra.mxu0 %v524_v10  ;;  %268 = vadd.xlane.f32.xlu0 %v267_v14 }
  0x42   : > { %379 = vrot.lane.b32.xlu0 %v274_v20, %s615_s19 }
  0xb5   : > { %v261_v15 = vpop.xlane.xlu0 %260 }
  0xb6   : > { %v262_v16 = vadd.f32 1e-30, %v261_v15 }
  0xb8   : > { %550 = vrsqrt.f32 %v262_v16 }
  0xb9   : > { %v269_v21 = vpop.xlane.xlu0 %268 }
  0xba   : > { %v270_v22 = vadd.f32 1e-30, %v269_v21 }
  0xbc   : > { %552 = vrsqrt.f32 %v270_v22 }
  0xbd   : > { %v380_v48 = vpop.permute.xlu0 %379 }
  0xc2   : > { %v551_v17 = vpop.eup %550 }
  0xc3   : > { %v264_v18 = vmin.f32 %v551_v17, 1.0 }
  0xc5   : > { %v265_v19 = vmul.f32 %v264_v18, %v255_v1 }
  0xc6   : > { %v553_v23 = vpop.eup %552 }
  0xc7   : > { %518 = vmatmul.mubr.msk.f32.vlgmr.msra.gmra.mrb[0].mxu0 %vm258_vm1, %v265_v19  ;;  %v272_v24 = vmin.f32 %v553_v23, 1.0 }
  0xc9   : > { %v273_v25 = vmul.f32 %v272_v24, %v256_v12 }
 0x19a   : > { %v348_v26 = vpop.f32.mrb[0].mxu0 }
 0x19b   : > { %v352_v27 = vmul.f32 %v348_v26, %v273_v25  ;;  %v519_v28 = vpop.f32.mrb[1].mxu0 }
 0x19d   : > { %v353_v29 = vsel %vm258_vm1, %v352_v27, 0.0 }
 0x19e   : > { %354 = vadd.xlane.f32.xlu1 %v353_v29 }
 0x1af   : > { %359 = vrot.lane.b32.xlu1 %v274_v20, %s616_s20 }
 0x22b   : > { %v355_v30 = vpop.xlane.xlu1 %354 }
 0x22c   : > { %v356_v31 = vadd.f32 %v355_v30, %v274_v20 }
 0x22e   : > { %v364_v32 = vand.u32 2147483647, %v356_v31  ;;  %v357_v43 = vmax.f32 %v356_v31, 0.0 }
 0x22f   : > { %v360_v38 = vpop.permute.xlu1 %359 }
 0x230   : > { %v365_v33 = vsub.f32 0.0, %v364_v32  ;;  %v362_v40 = vmul.f32 %v360_v38, %v356_v31 }
 0x232   : > { %v366_v34 = vmul.f32 1.442695, %v365_v33  ;;  %v363_v46 = vsub.f32 %v357_v43, %v362_v40 }
 0x234   : > { %554 = vpow2.f32 %v366_v34 }
 0x23e   : > { %v555_v35 = vpop.eup %554 }
 0x23f   : > { %v368_v36 = vadd.f32 1.0, %v555_v35  ;;  %v371_v37 = vmul.f32 -0.5, %v555_v35  ;;  %v374_v41 = vand.u32 2147483647, %v555_v35 }
 0x241   : > { %556 = vlog2.f32 %v368_v36  ;;  %v372_v39 = vadd.f32 1.0, %v371_v37  ;;  %vm375_vm3 = vcmp.lt.f32.partialorder %v374_v41, 0.0004427343 }
 0x243   : > { %v373_v45 = vmul.f32 %v555_v35, %v372_v39 }
 0x24b   : > { %v557_v42 = vpop.eup %556 }
 0x24c   : > { %v370_v44 = vmul.f32 0.6931472, %v557_v42 }
 0x24e   : > { %v376_v47 = vsel %vm375_vm3, %v373_v45, %v370_v44 }
 0x24f   : > { %v377_v49 = vadd.f32 %v376_v47, %v363_v46 }
 0x251   : > { %v382_v50 = vmul.f32 %v380_v48, %v377_v49 }
 0x253   : > { %v384_v51 = vsel %vm383_vm4, %v382_v50, 0.0 }
 0x254   : > { %385 = vadd.xlane.f32.xlu1 %v384_v51 }
 0x2e1   : > { %v386_v52 = vpop.xlane.xlu1 %385 }
 0x2e2   : > { %v387_v53 = vrot.slane %v386_v52, 4 }
 0x2e4   : > { %v388_v54 = vadd.f32 %v387_v53, %v386_v52 }
 0x2e6   : > { %v389_v55 = vrot.slane %v388_v54, 2 }
 0x2e8   : > { %v390_v56 = vadd.f32 %v389_v55, %v388_v54 }
 0x2ea   : > { %v391_v57 = vrot.slane %v390_v56, 1 }
 0x2ec   : > { %v392_v58 = vadd.f32 %v391_v57, %v390_v56 }
 0x2ee   : > { %526 = vpush %v392_v58 }
 0x31d   : > { %401 = sbr.rel (%p498_p11) target bundleno = 814 (0x32e), region = 44 }
 0x31f   : > { %s527_s21 = spop %526 }
 0x320   : > { %v394_v60 = vstv %s527_s21 }
 0x321   : > { %v395_v61 = vadd.f32 %v394_v60, %v378_v59 }
 0x323   : > { %397 = vst.msk [vmem:[#allocation4] sm:$0x1] %vm396_vm5, %v395_v61 }
 0x32a   : > { %v402_v62 = vld [vmem:[#allocation4] sm:$0x1] }
 0x32b   : > { %v403_v63 = vmul.f32 0.025, %v402_v62 }
 0x32d   : > { %404 = vst.msk [vmem:[#allocation4] sm:$0x1] %vm396_vm5, %v403_v63 }
 0x32e PF: > { %p532_p12 = scmp.eq.s32.totalorder %s657_s0, 5  ;;  %s617_s22 = smov [#allocation4]  }
 0x32f   : > { %s412_s24 = sshll.u32 %s617_s22, 4  ;;  %s413_s24 = int_to_ptr.vmem [resolvable:$true] %s412_s24 }
 0x330   : > { %s570_s25 = scalar_lea.vmem %s413_s24, 16  ;;  %s576_s26 = scalar_lea.vmem %s413_s24, 32 }
 0x331   : > { %p571_p13 = scmp.ne.s32.totalorder %s413_s24, %s570_s25  ;;  %p577_p2 = scmp.lt.s32.totalorder %s413_s24, %s413_s24 }
 0x332   : > { %p578_p3 = scmp.lt.s32.totalorder %s576_s26, %s570_s25 }
 0x333   : > { %p572_p0 = pnand %p571_p13, %p532_p12 }
 0x334   : > { %p579_p4 = por %p578_p3, %p577_p2 }
 0x335   : > { %p573_p1 = pneg %p572_p0 }
 0x337   : > { %p580_p5 = pnand %p579_p4, %p573_p1 }
 0x339   : > { %583 = shalt.err (!%p580_p5)
}
 0x33a   : > { %s584_s29 = scalar_lea.hbm %s728_s5, 16 }
 0x33b   : > { %p585_p6 = scmp.ne.s32.totalorder %s728_s5, %s584_s29  ;;  %p590_p9 = scmp.lt.u32.totalorder %s584_s29, %s728_s5 }
 0x33d   : > { %p586_p7 = pnand %p585_p6, %p532_p12 }
 0x33f   : > { %p587_p8 = pneg %p586_p7 }
 0x341   : > { %p592_p10 = pnand %p590_p9, %p587_p8 }
 0x343   : > { %595 = shalt.err (!%p592_p10)
}
 0x344   : > { %529 = dma.vmem_to_hbm [thread:$0]  (%p532_p12), %s413_s24, 16, %s728_s5, [#allocation5]  }
 0x345   : > { %603 = dma.done.wait (%p532_p12), [#allocation5], 16  }
 0x346   : > { %605 = vsyncadd (%p532_p12), [#allocation5], 4294967280 }
 0x347 PF: > { %s22_s23 = sadd.s32 1, %s608_s23  }
 0x348   : > { %p19_p11 = scmp.ge.s32.totalorder %s22_s23, 8  }
 0x34a   :  { %21 = sbr.rel (!%p19_p11) target bundleno = 16 (0x10), region = 80 }
 0x351   :  { %425 = vsyncpa [#allocation5], 1 }
 0x352   :  { %427 = vsyncpa [#allocation5 + $0x1], 1 }

</bundles_post_ra>
